<compile_context>
chip_gen: v5e
topology: v5e:2x2
jax: 0.10.0
libtpu: 0.0.40
codegen_flags: <defaults>
</compile_context>

<pallas_src>
import jax
import jax.numpy as jnp
from jax import lax
from jax.experimental import pallas as pl
from jax.experimental.pallas import tpu as pltpu


def _round_up(x, m):
    return ((x + m - 1) // m) * m


# ----------------------------------------------------------------------------
# Pallas kernels
# ----------------------------------------------------------------------------
def _mlp_logits(x_ref, w1_ref, b1_ref, w2_ref, b2_ref):
    """fusion Linear -> ReLU -> Dropout(eval=identity) -> classifier Linear (f32 acc)."""
    h = jnp.dot(x_ref[...], w1_ref[...], preferred_element_type=jnp.float32) + b1_ref[...]
    h = jnp.maximum(h, 0.0)                      # ReLU
    # Dropout(0.5): identity (eval-mode semantics).
    # TODO(synk): training-mode dropout would use pltpu.prng_seed + pltpu.prng_random_bits.
    h = h.astype(w2_ref.dtype)                   # back to bf16 for the second MXU pass
    return jnp.dot(h, w2_ref[...], preferred_element_type=jnp.float32) + b2_ref[...]


def _head_kernel(x_ref, w1_ref, b1_ref, w2_ref, b2_ref, logits_ref):
    """Logits-only path (labels=None)."""
    logits_ref[...] = _mlp_logits(x_ref, w1_ref, b1_ref, w2_ref, b2_ref).astype(
        logits_ref.dtype)


def _head_ce_kernel(x_ref, lbl_ref, w1_ref, b1_ref, w2_ref, b2_ref,
                    logits_ref, perex_ref):
    """Fused head + per-example cross-entropy (logits never leave VMEM/vregs)."""
    logits = _mlp_logits(x_ref, w1_ref, b1_ref, w2_ref, b2_ref)   # [tb, Lp] f32
    logits_ref[...] = logits.astype(logits_ref.dtype)
    # TODO(synk): add a loss-only kernel variant that skips the logits HBM writeback.

    tb, lp = logits.shape
    # Padded label columns already carry b2 = -1e30 -> no extra in-kernel mask needed.
    m = jnp.max(logits, axis=-1, keepdims=True)                    # [tb, 1]
    lse = m + jnp.log(jnp.sum(jnp.exp(logits - m), axis=-1, keepdims=True))

    # Vectorized one-hot pick: single vector load + one compare against a lane iota.
    col = lax.broadcasted_iota(jnp.int32, (tb, lp), 1)             # lane index
    label_col = lbl_ref[...]                                       # [tb, 1] int32
    picked = jnp.sum(jnp.where(col == label_col, logits, 0.0), axis=-1, keepdims=True)
    nll = lse - picked                                             # [tb, 1]

    # Lane-dense (1, tb) store: scatter the column vector onto a diagonal mask and
    # reduce over sublanes (no (tb,1)->(1,tb) relayout, no masked vst.msk stores).
    ri = lax.broadcasted_iota(jnp.int32, (tb, tb), 0)
    ci = lax.broadcasted_iota(jnp.int32, (tb, tb), 1)
    perex_ref[...] = jnp.sum(jnp.where(ri == ci, nll, 0.0), axis=0, keepdims=True)


# ----------------------------------------------------------------------------
# BlockSpec / compiler-param helpers
# ----------------------------------------------------------------------------
def _weight_specs(kp, dp, lp, single_buffer):
    """Specs for the grid-invariant w1/b1/w2/b2 operands.

    Their index_map is constant, so double-buffering buys nothing; single-buffering
    halves their VMEM footprint (matters at real head dims on v5e / v7x).
    """
    def spec(shape):
        if single_buffer:
            return pl.BlockSpec(shape, lambda b: (0, 0), pipeline_mode=pl.Buffered(1))
        return pl.BlockSpec(shape, lambda b: (0, 0))
    return [spec((kp, dp)), spec((1, dp)), spec((dp, lp)), spec((1, lp))]


def _compiler_params():
    # TODO(synk): on v7x use CORE_PARALLEL / pl.core_map so both TensorCores split the
    #             batch grid; plain "parallel" is a measured no-op on single-TC v5e/v6e.
    return pltpu.CompilerParams(
        dimension_semantics=("parallel",),
        vmem_limit_bytes=48 * 1024 * 1024,   # explicit raise over v5e's 16 MiB default
    )


# ----------------------------------------------------------------------------
# pallas_call wrappers
# ----------------------------------------------------------------------------
def _fused_head_ce_call(x_pad, labels_pad, w1_pad, b1_pad, w2_pad, b2_pad, *, tile_b):
    bp, kp = x_pad.shape
    dp = w1_pad.shape[1]
    lp = w2_pad.shape[1]
    g = bp // tile_b

    def run(single_buffer_weights):
        in_specs = [
            pl.BlockSpec((tile_b, kp), lambda b: (b, 0)),
            pl.BlockSpec((tile_b, 1), lambda b: (b, 0)),
        ] + _weight_specs(kp, dp, lp, single_buffer_weights)
        return pl.pallas_call(
            _head_ce_kernel,
            out_shape=(jax.ShapeDtypeStruct((bp, lp), jnp.float32),
                       jax.ShapeDtypeStruct((1, bp), jnp.float32)),
            grid=(g,),
            in_specs=in_specs,
            out_specs=(pl.BlockSpec((tile_b, lp), lambda b: (b, 0)),
                       pl.BlockSpec((1, tile_b), lambda b: (0, b))),
            compiler_params=_compiler_params(),
        )(x_pad, labels_pad, w1_pad, b1_pad, w2_pad, b2_pad)

    try:
        return run(True)
    except Exception:
        # Fallback for builds that reject pl.Buffered(1) on pallas_call BlockSpecs.
        return run(False)


def _head_only_call(x_pad, w1_pad, b1_pad, w2_pad, b2_pad, *, tile_b):
    bp, kp = x_pad.shape
    dp = w1_pad.shape[1]
    lp = w2_pad.shape[1]
    g = bp // tile_b

    def run(single_buffer_weights):
        in_specs = [pl.BlockSpec((tile_b, kp), lambda b: (b, 0))] + _weight_specs(
            kp, dp, lp, single_buffer_weights)
        return pl.pallas_call(
            _head_kernel,
            out_shape=jax.ShapeDtypeStruct((bp, lp), jnp.float32),
            grid=(g,),
            in_specs=in_specs,
            out_specs=pl.BlockSpec((tile_b, lp), lambda b: (b, 0)),
            compiler_params=_compiler_params(),
        )(x_pad, w1_pad, b1_pad, w2_pad, b2_pad)

    try:
        return run(True)
    except Exception:
        return run(False)


# ----------------------------------------------------------------------------
# One-time padded / cast weight cache (reused across forward calls)
# ----------------------------------------------------------------------------
def prepare_head_cache(params, compute_dtype=jnp.bfloat16):
    """Pad feature dims to lane multiples and cast MXU operands once."""
    w1 = params["fusion_w"].astype(jnp.float32)
    b1 = params["fusion_b"].astype(jnp.float32)
    w2 = params["clf_w"].astype(jnp.float32)
    b2 = params["clf_b"].astype(jnp.float32)
    K, D = w1.shape
    L = w2.shape[1]
    Kp, Dp, Lp = _round_up(K, 128), _round_up(D, 128), _round_up(L, 128)

    w1_pad = jnp.zeros((Kp, Dp), jnp.float32).at[:K, :D].set(w1).astype(compute_dtype)
    b1_pad = jnp.zeros((1, Dp), jnp.float32).at[0, :D].set(b1)
    w2_pad = jnp.zeros((Dp, Lp), jnp.float32).at[:D, :L].set(w2).astype(compute_dtype)
    # Padded label columns get bias -1e30 -> logits ~ -inf, so the kernel LSE needs no
    # column mask.  b2 must stay f32 (bf16 would overflow the sentinel).
    b2_pad = jnp.full((1, Lp), -1e30, jnp.float32).at[0, :L].set(b2)

    return {"w1": w1_pad, "b1": b1_pad, "w2": w2_pad, "b2": b2_pad,
            "K": K, "D": D, "L": L, "Kp": Kp, "Dp": Dp, "Lp": Lp,
            "dtype": compute_dtype}


# ----------------------------------------------------------------------------
# Deterministic surrogate encoders (plain-JAX glue; NOT the pretrained models)
# ----------------------------------------------------------------------------
def text_encoder_pooler(params, input_ids, attention_mask):
    """Stand-in for AutoModel(bert).pooler_output: embed -> masked mean -> dense+tanh."""
    emb = params["tok_emb"][input_ids]                              # [B, S, Ht]
    mask = attention_mask.astype(jnp.float32)[..., None]            # [B, S, 1]
    pooled = jnp.sum(emb * mask, axis=1) / jnp.maximum(jnp.sum(mask, axis=1), 1.0)
    return jnp.tanh(pooled @ params["txt_pool_w"] + params["txt_pool_b"])   # [B, Ht]


def image_encoder_pooler(params, pixel_values, patch=8):
    """Stand-in for AutoModel(vit).pooler_output: patchify -> embed -> mean -> dense+tanh."""
    B, C, H, W = pixel_values.shape                                  # NCHW
    ph, pw = H // patch, W // patch
    x = pixel_values.reshape(B, C, ph, patch, pw, patch)
    x = jnp.transpose(x, (0, 2, 4, 1, 3, 5)).reshape(B, ph * pw, C * patch * patch)
    tok = x @ params["patch_w"] + params["patch_b"]                  # [B, P, Hi]
    pooled = jnp.mean(tok, axis=1)                                   # [B, Hi]
    return jnp.tanh(pooled @ params["img_pool_w"] + params["img_pool_b"])   # [B, Hi]


# ----------------------------------------------------------------------------
# Full forward (mirrors MultimodalVQAModel.forward)
# ----------------------------------------------------------------------------
def multimodal_vqa_forward(params, input_ids, pixel_values, attention_mask=None,
                           token_type_ids=None, labels=None, head_cache=None):
    # token_type_ids would only matter to the real BERT encoder; unused by the surrogate.
    del token_type_ids
    if attention_mask is None:
        attention_mask = jnp.ones_like(input_ids)
    if head_cache is None:
        head_cache = prepare_head_cache(params)

    text_pool = text_encoder_pooler(params, input_ids, attention_mask)      # [B, Ht]
    image_pool = image_encoder_pooler(params, pixel_values)                 # [B, Hi]

    # Concat once in XLA (cheap) -> single K-dim matmul inside the kernel.
    fused_in = jnp.concatenate([text_pool, image_pool], axis=1).astype(jnp.float32)
    B, K = fused_in.shape
    assert K == head_cache["K"]
    Kp, L = head_cache["Kp"], head_cache["L"]

    # Batch tiling: 256-row tiles fill v6e/v7x 2x256^2 MXUs and halve grid-step
    # overhead; small batches get one sublane-rounded tile.
    # TODO(synk): keep tile_b=128 on v5e (4x128^2 MXU gains nothing from 256).
    if B >= 256:
        tile_b = 256
    elif B > 128:
        tile_b = 128
    else:
        tile_b = _round_up(B, 8)
    Bp = _round_up(B, tile_b)

    x_pad = (jnp.zeros((Bp, Kp), jnp.float32).at[:B, :K].set(fused_in)
             .astype(head_cache["dtype"]))

    if labels is not None:
        labels_pad = jnp.zeros((Bp, 1), jnp.int32).at[:B, 0].set(labels.astype(jnp.int32))
        logits_pad, per_ex = _fused_head_ce_call(
            x_pad, labels_pad, head_cache["w1"], head_cache["b1"],
            head_cache["w2"], head_cache["b2"], tile_b=tile_b)
        logits = logits_pad[:B, :L]
        loss = jnp.sum(per_ex[0, :B]) / jnp.float32(B)   # mean over real batch rows
        return {"logits": logits, "loss": loss}

    logits_pad = _head_only_call(x_pad, head_cache["w1"], head_cache["b1"],
                                 head_cache["w2"], head_cache["b2"], tile_b=tile_b)
    return {"logits": logits_pad[:B, :L]}


# ----------------------------------------------------------------------------
# Deterministic parameter init + example run
# ----------------------------------------------------------------------------
def init_params(key, vocab=100, txt_hidden=32, img_hidden=32,
                patch=8, channels=3, intermediate_dim=64, num_labels=16):
    ks = jax.random.split(key, 10)
    patch_dim = channels * patch * patch
    s = 0.02
    return {
        "tok_emb":    s * jax.random.normal(ks[0], (vocab, txt_hidden), jnp.float32),
        "txt_pool_w": s * jax.random.normal(ks[1], (txt_hidden, txt_hidden), jnp.float32),
        "txt_pool_b": jnp.zeros((txt_hidden,), jnp.float32),
        "patch_w":    s * jax.random.normal(ks[2], (patch_dim, img_hidden), jnp.float32),
        "patch_b":    jnp.zeros((img_hidden,), jnp.float32),
        "img_pool_w": s * jax.random.normal(ks[3], (img_hidden, img_hidden), jnp.float32),
        "img_pool_b": jnp.zeros((img_hidden,), jnp.float32),
        # fusion = nn.Linear(txt_hidden + img_hidden, intermediate_dim)
        "fusion_w":   s * jax.random.normal(ks[4], (txt_hidden + img_hidden, intermediate_dim), jnp.float32),
        "fusion_b":   s * jax.random.normal(ks[5], (intermediate_dim,), jnp.float32),
        # classifier = nn.Linear(intermediate_dim, num_labels)
        "clf_w":      s * jax.random.normal(ks[6], (intermediate_dim, num_labels), jnp.float32),
        "clf_b":      s * jax.random.normal(ks[7], (num_labels,), jnp.float32),
    }


if __name__ == "__main__":
    key = jax.random.PRNGKey(0)
    k_param, k_ids, k_pix, k_lab = jax.random.split(key, 4)

    B, S = 2, 8
    num_labels = 16
    params = init_params(k_param, num_labels=num_labels)
    head_cache = prepare_head_cache(params)       # pad + cast weights once

    input_ids = jax.random.randint(k_ids, (B, S), 0, 100, dtype=jnp.int32)
    attention_mask = jnp.ones((B, S), jnp.int32)
    token_type_ids = jnp.zeros((B, S), jnp.int32)
    pixel_values = jax.random.normal(k_pix, (B, 3, 16, 16), jnp.float32)   # NCHW
    labels = jax.random.randint(k_lab, (B,), 0, num_labels, dtype=jnp.int32)

    out = multimodal_vqa_forward(params, input_ids, pixel_values,
                                 attention_mask=attention_mask,
                                 token_type_ids=token_type_ids,
                                 labels=labels, head_cache=head_cache)
    jax.block_until_ready(out["logits"])
    jax.block_until_ready(out["loss"])
    assert out["logits"].shape == (B, num_labels)
    assert out["loss"].shape == ()
    assert bool(jnp.isfinite(out["loss"]))
    assert bool(jnp.all(jnp.isfinite(out["logits"])))

    # Also exercise the labels=None (logits-only) path.
    out2 = multimodal_vqa_forward(params, input_ids, pixel_values,
                                  attention_mask=attention_mask, head_cache=head_cache)
    jax.block_until_ready(out2["logits"])
    assert out2["logits"].shape == (B, num_labels)
    print("KERNEL_OK")
</pallas_src>

<mosaic_0001>
module attributes {stable_mosaic.version = 11 : i64} {
  func.func @_head_ce_kernel(%arg0: i32, %arg1: memref<8x128xbf16, #tpu.memory_space<vmem>>, %arg2: memref<8x1xi32, #tpu.memory_space<vmem>>, %arg3: memref<128x128xbf16, #tpu.memory_space<vmem>>, %arg4: memref<1x128xf32, #tpu.memory_space<vmem>>, %arg5: memref<128x128xbf16, #tpu.memory_space<vmem>>, %arg6: memref<1x128xf32, #tpu.memory_space<vmem>>, %arg7: memref<8x128xf32, #tpu.memory_space<vmem>>, %arg8: memref<1x8xf32, #tpu.memory_space<vmem>>) attributes {dimension_semantics = [#tpu.dimension_semantics<parallel>], iteration_bounds = array<i64: 1>, scalar_prefetch = 0 : i64, scratch_operands = 0 : i64, tpu.core_type = #tpu.core_type<tc>, window_params = [{transform_indices = @transform_0, window_bounds = array<i64: 8, 128>}, {transform_indices = @transform_1, window_bounds = array<i64: 8, 1>}, {pipeline_mode = #tpu.pipeline_mode<synchronous>, transform_indices = @transform_2, window_bounds = array<i64: 128, 128>}, {pipeline_mode = #tpu.pipeline_mode<synchronous>, transform_indices = @transform_3, window_bounds = array<i64: 1, 128>}, {pipeline_mode = #tpu.pipeline_mode<synchronous>, transform_indices = @transform_4, window_bounds = array<i64: 128, 128>}, {pipeline_mode = #tpu.pipeline_mode<synchronous>, transform_indices = @transform_5, window_bounds = array<i64: 1, 128>}, {transform_indices = @transform_6, window_bounds = array<i64: 8, 128>}, {transform_indices = @transform_7, window_bounds = array<i64: 1, 8>}]} {
    %c0 = arith.constant 0 : index
    %c0_0 = arith.constant 0 : index
    %0 = vector.load %arg1[%c0, %c0_0] : memref<8x128xbf16, #tpu.memory_space<vmem>>, vector<8x128xbf16>
    %c0_1 = arith.constant 0 : index
    %c0_2 = arith.constant 0 : index
    %1 = vector.load %arg3[%c0_1, %c0_2] : memref<128x128xbf16, #tpu.memory_space<vmem>>, vector<128x128xbf16>
    %cst = arith.constant dense<0.000000e+00> : vector<8x128xf32>
    %2 = tpu.matmul %0, %1, %cst {dimension_numbers = #tpu.dot_dimension_numbers<[1], [0], [0], [1], [0, 0, 1, 1], [], []>} : vector<8x128xbf16>, vector<128x128xbf16>, vector<8x128xf32> -> vector<8x128xf32>
    %c0_3 = arith.constant 0 : index
    %c0_4 = arith.constant 0 : index
    %3 = vector.load %arg4[%c0_3, %c0_4] : memref<1x128xf32, #tpu.memory_space<vmem>>, vector<1x128xf32>
    %4 = vector.broadcast %3 : vector<1x128xf32> to vector<8x128xf32>
    %5 = arith.addf %2, %4 : vector<8x128xf32>
    %cst_5 = arith.constant 0.000000e+00 : f32
    %6 = vector.broadcast %cst_5 : f32 to vector<8x128xf32>
    %7 = arith.maximumf %5, %6 : vector<8x128xf32>
    %8 = arith.truncf %7 : vector<8x128xf32> to vector<8x128xbf16>
    %c0_6 = arith.constant 0 : index
    %c0_7 = arith.constant 0 : index
    %9 = vector.load %arg5[%c0_6, %c0_7] : memref<128x128xbf16, #tpu.memory_space<vmem>>, vector<128x128xbf16>
    %cst_8 = arith.constant dense<0.000000e+00> : vector<8x128xf32>
    %10 = tpu.matmul %8, %9, %cst_8 {dimension_numbers = #tpu.dot_dimension_numbers<[1], [0], [0], [1], [0, 0, 1, 1], [], []>} : vector<8x128xbf16>, vector<128x128xbf16>, vector<8x128xf32> -> vector<8x128xf32>
    %c0_9 = arith.constant 0 : index
    %c0_10 = arith.constant 0 : index
    %11 = vector.load %arg6[%c0_9, %c0_10] : memref<1x128xf32, #tpu.memory_space<vmem>>, vector<1x128xf32>
    %12 = vector.broadcast %11 : vector<1x128xf32> to vector<8x128xf32>
    %13 = arith.addf %10, %12 : vector<8x128xf32>
    %c0_11 = arith.constant 0 : index
    %c0_12 = arith.constant 0 : index
    %14 = vector.load %arg7[%c0_11, %c0_12] : memref<8x128xf32, #tpu.memory_space<vmem>>, vector<8x128xf32>
    tpu.vector_store %arg7[%c0_11, %c0_12], %13 {strides = array<i32>} : memref<8x128xf32, #tpu.memory_space<vmem>>, vector<8x128xf32>,
    %cst_13 = arith.constant dense<0xFF800000> : vector<8xf32>
    %15 = vector.multi_reduction <maximumf>, %13, %cst_13 [1] : vector<8x128xf32> to vector<8xf32>
    %16 = vector.shape_cast %15 : vector<8xf32> to vector<8x1xf32>
    %17 = vector.broadcast %16 : vector<8x1xf32> to vector<8x128xf32>
    %18 = arith.subf %13, %17 : vector<8x128xf32>
    %19 = math.exp %18 : vector<8x128xf32>
    %cst_14 = arith.constant dense<0.000000e+00> : vector<8xf32>
    %20 = vector.multi_reduction <add>, %19, %cst_14 [1] : vector<8x128xf32> to vector<8xf32>
    %21 = vector.shape_cast %20 : vector<8xf32> to vector<8x1xf32>
    %22 = math.log %21 : vector<8x1xf32>
    %23 = arith.addf %16, %22 : vector<8x1xf32>
    %24 = tpu.iota {dimensions = array<i32: 1>} : vector<8x128xi32>
    %c0_15 = arith.constant 0 : index
    %c0_16 = arith.constant 0 : index
    %25 = vector.load %arg2[%c0_15, %c0_16] : memref<8x1xi32, #tpu.memory_space<vmem>>, vector<8x1xi32>
    %26 = vector.broadcast %25 : vector<8x1xi32> to vector<8x128xi32>
    %27 = arith.cmpi eq, %24, %26 : vector<8x128xi32>
    %cst_17 = arith.constant 0.000000e+00 : f32
    %28 = vector.broadcast %cst_17 : f32 to vector<8x128xf32>
    %29 = arith.select %27, %13, %28 : vector<8x128xi1>, vector<8x128xf32>
    %cst_18 = arith.constant dense<0.000000e+00> : vector<8xf32>
    %30 = vector.multi_reduction <add>, %29, %cst_18 [1] : vector<8x128xf32> to vector<8xf32>
    %31 = vector.shape_cast %30 : vector<8xf32> to vector<8x1xf32>
    %32 = arith.subf %23, %31 : vector<8x1xf32>
    %33 = tpu.iota {dimensions = array<i32: 0>} : vector<8x8xi32>
    %34 = tpu.iota {dimensions = array<i32: 1>} : vector<8x8xi32>
    %35 = arith.cmpi eq, %33, %34 : vector<8x8xi32>
    %cst_19 = arith.constant 0.000000e+00 : f32
    %36 = vector.shape_cast %32 : vector<8x1xf32> to vector<8x1xf32>
    %37 = vector.broadcast %36 : vector<8x1xf32> to vector<8x8xf32>
    %38 = vector.broadcast %cst_19 : f32 to vector<8x8xf32>
    %39 = arith.select %35, %37, %38 : vector<8x8xi1>, vector<8x8xf32>
    %cst_20 = arith.constant dense<0.000000e+00> : vector<8xf32>
    %40 = vector.multi_reduction <add>, %39, %cst_20 [0] : vector<8x8xf32> to vector<8xf32>
    %41 = vector.shape_cast %40 : vector<8xf32> to vector<1x8xf32>
    %c0_21 = arith.constant 0 : index
    %c0_22 = arith.constant 0 : index
    %42 = vector.load %arg8[%c0_21, %c0_22] : memref<1x8xf32, #tpu.memory_space<vmem>>, vector<1x8xf32>
    tpu.vector_store %arg8[%c0_21, %c0_22], %41 {strides = array<i32>} : memref<1x8xf32, #tpu.memory_space<vmem>>, vector<1x8xf32>,
    return
  }
  func.func @transform_0(%arg0: i32) -> (i32, i32) {
    %c0_i32 = arith.constant 0 : i32
    %c0_i32_0 = arith.constant 0 : i32
    return %arg0, %c0_i32 : i32, i32
  }
  func.func @transform_1(%arg0: i32) -> (i32, i32) {
    %c0_i32 = arith.constant 0 : i32
    %c0_i32_0 = arith.constant 0 : i32
    return %arg0, %c0_i32 : i32, i32
  }
  func.func @transform_2(%arg0: i32) -> (i32, i32) {
    %c0_i32 = arith.constant 0 : i32
    %c0_i32_0 = arith.constant 0 : i32
    %c0_i32_1 = arith.constant 0 : i32
    return %c0_i32, %c0_i32_0 : i32, i32
  }
  func.func @transform_3(%arg0: i32) -> (i32, i32) {
    %c0_i32 = arith.constant 0 : i32
    %c0_i32_0 = arith.constant 0 : i32
    %c0_i32_1 = arith.constant 0 : i32
    return %c0_i32, %c0_i32_0 : i32, i32
  }
  func.func @transform_4(%arg0: i32) -> (i32, i32) {
    %c0_i32 = arith.constant 0 : i32
    %c0_i32_0 = arith.constant 0 : i32
    %c0_i32_1 = arith.constant 0 : i32
    return %c0_i32, %c0_i32_0 : i32, i32
  }
  func.func @transform_5(%arg0: i32) -> (i32, i32) {
    %c0_i32 = arith.constant 0 : i32
    %c0_i32_0 = arith.constant 0 : i32
    %c0_i32_1 = arith.constant 0 : i32
    return %c0_i32, %c0_i32_0 : i32, i32
  }
  func.func @transform_6(%arg0: i32) -> (i32, i32) {
    %c0_i32 = arith.constant 0 : i32
    %c0_i32_0 = arith.constant 0 : i32
    return %arg0, %c0_i32 : i32, i32
  }
  func.func @transform_7(%arg0: i32) -> (i32, i32) {
    %c0_i32 = arith.constant 0 : i32
    %c0_i32_0 = arith.constant 0 : i32
    return %c0_i32, %arg0 : i32, i32
  }
}

module attributes {stable_mosaic.version = 11 : i64} {
  func.func @_head_ce_kernel(%arg0: i32, %arg1: memref<8x128xbf16, #tpu.memory_space<vmem>>, %arg2: memref<8x1xi32, #tpu.memory_space<vmem>>, %arg3: memref<128x128xbf16, #tpu.memory_space<vmem>>, %arg4: memref<1x128xf32, #tpu.memory_space<vmem>>, %arg5: memref<128x128xbf16, #tpu.memory_space<vmem>>, %arg6: memref<1x128xf32, #tpu.memory_space<vmem>>, %arg7: memref<8x128xf32, #tpu.memory_space<vmem>>, %arg8: memref<1x8xf32, #tpu.memory_space<vmem>>) attributes {dimension_semantics = [#tpu.dimension_semantics<parallel>], iteration_bounds = array<i64: 1>, scalar_prefetch = 0 : i64, scratch_operands = 0 : i64, tpu.core_type = #tpu.core_type<tc>, window_params = [{transform_indices = @transform_0, window_bounds = array<i64: 8, 128>}, {transform_indices = @transform_1, window_bounds = array<i64: 8, 1>}, {pipeline_mode = #tpu.pipeline_mode<synchronous>, transform_indices = @transform_2, window_bounds = array<i64: 128, 128>}, {pipeline_mode = #tpu.pipeline_mode<synchronous>, transform_indices = @transform_3, window_bounds = array<i64: 1, 128>}, {pipeline_mode = #tpu.pipeline_mode<synchronous>, transform_indices = @transform_4, window_bounds = array<i64: 128, 128>}, {pipeline_mode = #tpu.pipeline_mode<synchronous>, transform_indices = @transform_5, window_bounds = array<i64: 1, 128>}, {transform_indices = @transform_6, window_bounds = array<i64: 8, 128>}, {transform_indices = @transform_7, window_bounds = array<i64: 1, 8>}]} {
    %c0 = arith.constant 0 : index
    %c0_0 = arith.constant 0 : index
    %0 = vector.load %arg1[%c0, %c0_0] : memref<8x128xbf16, #tpu.memory_space<vmem>>, vector<8x128xbf16>
    %c0_1 = arith.constant 0 : index
    %c0_2 = arith.constant 0 : index
    %1 = vector.load %arg3[%c0_1, %c0_2] : memref<128x128xbf16, #tpu.memory_space<vmem>>, vector<128x128xbf16>
    %cst = arith.constant dense<0.000000e+00> : vector<8x128xf32>
    %2 = tpu.matmul %0, %1, %cst {dimension_numbers = #tpu.dot_dimension_numbers<[1], [0], [0], [1], [0, 0, 1, 1], [], []>} : vector<8x128xbf16>, vector<128x128xbf16>, vector<8x128xf32> -> vector<8x128xf32>
    %c0_3 = arith.constant 0 : index
    %c0_4 = arith.constant 0 : index
    %3 = vector.load %arg4[%c0_3, %c0_4] : memref<1x128xf32, #tpu.memory_space<vmem>>, vector<1x128xf32>
    %4 = vector.broadcast %3 : vector<1x128xf32> to vector<8x128xf32>
    %5 = arith.addf %2, %4 : vector<8x128xf32>
    %cst_5 = arith.constant 0.000000e+00 : f32
    %6 = vector.broadcast %cst_5 : f32 to vector<8x128xf32>
    %7 = arith.maximumf %5, %6 : vector<8x128xf32>
    %8 = arith.truncf %7 : vector<8x128xf32> to vector<8x128xbf16>
    %c0_6 = arith.constant 0 : index
    %c0_7 = arith.constant 0 : index
    %9 = vector.load %arg5[%c0_6, %c0_7] : memref<128x128xbf16, #tpu.memory_space<vmem>>, vector<128x128xbf16>
    %cst_8 = arith.constant dense<0.000000e+00> : vector<8x128xf32>
    %10 = tpu.matmul %8, %9, %cst_8 {dimension_numbers = #tpu.dot_dimension_numbers<[1], [0], [0], [1], [0, 0, 1, 1], [], []>} : vector<8x128xbf16>, vector<128x128xbf16>, vector<8x128xf32> -> vector<8x128xf32>
    %c0_9 = arith.constant 0 : index
    %c0_10 = arith.constant 0 : index
    %11 = vector.load %arg6[%c0_9, %c0_10] : memref<1x128xf32, #tpu.memory_space<vmem>>, vector<1x128xf32>
    %12 = vector.broadcast %11 : vector<1x128xf32> to vector<8x128xf32>
    %13 = arith.addf %10, %12 : vector<8x128xf32>
    %c0_11 = arith.constant 0 : index
    %c0_12 = arith.constant 0 : index
    %14 = vector.load %arg7[%c0_11, %c0_12] : memref<8x128xf32, #tpu.memory_space<vmem>>, vector<8x128xf32>
    tpu.vector_store %arg7[%c0_11, %c0_12], %13 {strides = array<i32>} : memref<8x128xf32, #tpu.memory_space<vmem>>, vector<8x128xf32>,
    %cst_13 = arith.constant dense<0xFF800000> : vector<8xf32>
    %15 = vector.multi_reduction <maximumf>, %13, %cst_13 [1] : vector<8x128xf32> to vector<8xf32>
    %16 = vector.shape_cast %15 : vector<8xf32> to vector<8x1xf32>
    %17 = vector.broadcast %16 : vector<8x1xf32> to vector<8x128xf32>
    %18 = arith.subf %13, %17 : vector<8x128xf32>
    %19 = math.exp %18 : vector<8x128xf32>
    %cst_14 = arith.constant dense<0.000000e+00> : vector<8xf32>
    %20 = vector.multi_reduction <add>, %19, %cst_14 [1] : vector<8x128xf32> to vector<8xf32>
    %21 = vector.shape_cast %20 : vector<8xf32> to vector<8x1xf32>
    %22 = math.log %21 : vector<8x1xf32>
    %23 = arith.addf %16, %22 : vector<8x1xf32>
    %24 = tpu.iota {dimensions = array<i32: 1>} : vector<8x128xi32>
    %c0_15 = arith.constant 0 : index
    %c0_16 = arith.constant 0 : index
    %25 = vector.load %arg2[%c0_15, %c0_16] : memref<8x1xi32, #tpu.memory_space<vmem>>, vector<8x1xi32>
    %26 = vector.broadcast %25 : vector<8x1xi32> to vector<8x128xi32>
    %27 = arith.cmpi eq, %24, %26 : vector<8x128xi32>
    %cst_17 = arith.constant 0.000000e+00 : f32
    %28 = vector.broadcast %cst_17 : f32 to vector<8x128xf32>
    %29 = arith.select %27, %13, %28 : vector<8x128xi1>, vector<8x128xf32>
    %cst_18 = arith.constant dense<0.000000e+00> : vector<8xf32>
    %30 = vector.multi_reduction <add>, %29, %cst_18 [1] : vector<8x128xf32> to vector<8xf32>
    %31 = vector.shape_cast %30 : vector<8xf32> to vector<8x1xf32>
    %32 = arith.subf %23, %31 : vector<8x1xf32>
    %33 = tpu.iota {dimensions = array<i32: 0>} : vector<8x8xi32>
    %34 = tpu.iota {dimensions = array<i32: 1>} : vector<8x8xi32>
    %35 = arith.cmpi eq, %33, %34 : vector<8x8xi32>
    %cst_19 = arith.constant 0.000000e+00 : f32
    %36 = vector.shape_cast %32 : vector<8x1xf32> to vector<8x1xf32>
    %37 = vector.broadcast %36 : vector<8x1xf32> to vector<8x8xf32>
    %38 = vector.broadcast %cst_19 : f32 to vector<8x8xf32>
    %39 = arith.select %35, %37, %38 : vector<8x8xi1>, vector<8x8xf32>
    %cst_20 = arith.constant dense<0.000000e+00> : vector<8xf32>
    %40 = vector.multi_reduction <add>, %39, %cst_20 [0] : vector<8x8xf32> to vector<8xf32>
    %41 = vector.shape_cast %40 : vector<8xf32> to vector<1x8xf32>
    %c0_21 = arith.constant 0 : index
    %c0_22 = arith.constant 0 : index
    %42 = vector.load %arg8[%c0_21, %c0_22] : memref<1x8xf32, #tpu.memory_space<vmem>>, vector<1x8xf32>
    tpu.vector_store %arg8[%c0_21, %c0_22], %41 {strides = array<i32>} : memref<1x8xf32, #tpu.memory_space<vmem>>, vector<1x8xf32>,
    return
  }
  func.func @transform_0(%arg0: i32) -> (i32, i32) {
    %c0_i32 = arith.constant 0 : i32
    %c0_i32_0 = arith.constant 0 : i32
    return %arg0, %c0_i32 : i32, i32
  }
  func.func @transform_1(%arg0: i32) -> (i32, i32) {
    %c0_i32 = arith.constant 0 : i32
    %c0_i32_0 = arith.constant 0 : i32
    return %arg0, %c0_i32 : i32, i32
  }
  func.func @transform_2(%arg0: i32) -> (i32, i32) {
    %c0_i32 = arith.constant 0 : i32
    %c0_i32_0 = arith.constant 0 : i32
    %c0_i32_1 = arith.constant 0 : i32
    return %c0_i32, %c0_i32_0 : i32, i32
  }
  func.func @transform_3(%arg0: i32) -> (i32, i32) {
    %c0_i32 = arith.constant 0 : i32
    %c0_i32_0 = arith.constant 0 : i32
    %c0_i32_1 = arith.constant 0 : i32
    return %c0_i32, %c0_i32_0 : i32, i32
  }
  func.func @transform_4(%arg0: i32) -> (i32, i32) {
    %c0_i32 = arith.constant 0 : i32
    %c0_i32_0 = arith.constant 0 : i32
    %c0_i32_1 = arith.constant 0 : i32
    return %c0_i32, %c0_i32_0 : i32, i32
  }
  func.func @transform_5(%arg0: i32) -> (i32, i32) {
    %c0_i32 = arith.constant 0 : i32
    %c0_i32_0 = arith.constant 0 : i32
    %c0_i32_1 = arith.constant 0 : i32
    return %c0_i32, %c0_i32_0 : i32, i32
  }
  func.func @transform_6(%arg0: i32) -> (i32, i32) {
    %c0_i32 = arith.constant 0 : i32
    %c0_i32_0 = arith.constant 0 : i32
    return %arg0, %c0_i32 : i32, i32
  }
  func.func @transform_7(%arg0: i32) -> (i32, i32) {
    %c0_i32 = arith.constant 0 : i32
    %c0_i32_0 = arith.constant 0 : i32
    return %c0_i32, %arg0 : i32, i32
  }
}

</mosaic_0001>

<bundles_post_ra>
// kernel: tpu_custom_call.1
= control target key start
LH: loop header
LB: loop body
LE: loop exit
PB: predicated region body
PF: predicated region fallthrough
CT: control target
= control target key end

     0   :  { %13 = vsyncpa [#allocation3], 0  ;;  %s563_s0 = inlined_call_operand.vmem [shape: bf16[8,128], index: 0, kind: input, shape index: {}]   ;;  %s564_s1 = inlined_call_operand.vmem [shape: s32[8,1], index: 1, kind: input, shape index: {}]   ;;  %s565_s2 = inlined_call_operand.hbm [shape: bf16[128,128], index: 2, kind: input, shape index: {}]   ;;  %s566_s3 = inlined_call_operand.vmem [shape: f32[1,128], index: 3, kind: input, shape index: {}]   ;;  %s567_s4 = inlined_call_operand.hbm [shape: bf16[128,128], index: 4, kind: input, shape index: {}]   ;;  %s568_s5 = inlined_call_operand.vmem [shape: f32[1,128], index: 5, kind: input, shape index: {}]   ;;  %s569_s6 = inlined_call_operand.hbm [shape: f32[8,128], index: 6, kind: output, shape index: {0}]   ;;  %s570_s7 = inlined_call_operand.hbm [shape: f32[1,8], index: 7, kind: output, shape index: {1}]  }
   0x1   :  { %14 = vsyncpa [#allocation6], 0 }
   0x2   :  { %15 = vsyncpa [#allocation4], 0 }
   0x3   :  { %16 = vsyncpa [#allocation9], 0  ;;  %s25_s26 = sshll.u32 %s565_s2, 4  ;;  %s492_s27 = smov [#allocation2]   ;;  %s26_s26 = int_to_ptr.hbm [resolvable:$true] %s25_s26 }
   0x4   :  { %s27_s28 = sshll.u32 %s492_s27, 4  ;;  %s40_s8 = sshll.u32 %s567_s4, 4  ;;  %s28_s28 = int_to_ptr.vmem [resolvable:$true] %s27_s28  ;;  %s41_s8 = int_to_ptr.hbm [resolvable:$true] %s40_s8 }
   0x5   :  { %s493_s9 = smov 64   ;;  %s494_s10 = smov 4  }
   0x6   :  { %33 = dma.hbm_to_vmem [thread:$0]  %s26_s26, 1024, %s28_s28, [#allocation3], %s493_s9, %s493_s9, %s494_s10  }
   0x7   :  { %s495_s11 = smov [#allocation5]  }
   0x8   :  { %s42_s12 = sshll.u32 %s495_s11, 4  ;;  %s43_s12 = int_to_ptr.vmem [resolvable:$true] %s42_s12 }
   0x9   :  { %48 = dma.hbm_to_vmem [thread:$0]  %s41_s8, 1024, %s43_s12, [#allocation6], %s493_s9, %s493_s9, %s494_s10  }
   0xa   :  { %484 = dma.done.wait [#allocation3], 1024  }
   0xb   :  { %485 = vsyncadd [#allocation3], 4294966272 }
   0xc   :  { %486 = dma.done.wait [#allocation6], 1024  }
   0xd   :  { %487 = vsyncadd [#allocation6], 4294966272  ;;  %v365_v0 = vld [vmem:[#allocation2 + $0x38] sm:$0xff]  ;;  %v364_v1 = vld [vmem:[#allocation2 + $0x30] sm:$0xff]  ;;  %v496_v23 = vmov 0   ;;  %v235_v33 = vlaneseq  ;;  %s267_s18 = sshll.u32 %s569_s6, 4  ;;  %s268_s18 = int_to_ptr.hbm [resolvable:$true] %s267_s18 }
   0xe   :  { %128 = vmatpush.bf16.msra.mxu0 %v365_v0  ;;  %v373_v2 = vld [vmem:[#allocation5 + $0x38] sm:$0xff]  ;;  %v372_v3 = vld [vmem:[#allocation5 + $0x30] sm:$0xff]  ;;  %v363_v4 = vld [vmem:[#allocation2 + $0x28] sm:$0xff]  ;;  %381 = vset.pattern.permute.xlu0 %v496_v23  ;;  %s497_s19 = smov [#allocation7]   ;;  %vm250_vm2 = vcmask 64512   ;;  %s278_s23 = sshll.u32 %s570_s7, 4  ;;  %s279_s23 = int_to_ptr.hbm [resolvable:$true] %s278_s23 }
   0xf   :  { %211 = vmatpush.bf16.msra.mxu1 %v373_v2  ;;  %v371_v5 = vld [vmem:[#allocation5 + $0x28] sm:$0xff]  ;;  %v362_v6 = vld [vmem:[#allocation2 + $0x20] sm:$0xff]  ;;  %v361_v8 = vld [vmem:[#allocation2 + $0x18] sm:$0xff]  ;;  %v236_v34 = vand.u32 127, %v235_v33  ;;  %s265_s20 = sshll.u32 %s497_s19, 4  ;;  %v247_v39 = vshrl.u32 %v235_v33, 7  ;;  %s266_s20 = int_to_ptr.vmem [resolvable:$true] %s265_s20 }
  0x10   :  { %v370_v7 = vld [vmem:[#allocation5 + $0x20] sm:$0xff]  ;;  %v369_v9 = vld [vmem:[#allocation5 + $0x18] sm:$0xff]  ;;  %v360_v10 = vld [vmem:[#allocation2 + $0x10] sm:$0xff]  ;;  %vm258_vm3 = vcmask 57344  }
  0x11   :  { %v368_v11 = vld [vmem:[#allocation5 + $0x10] sm:$0xff]  ;;  %v359_v12 = vld [vmem:[#allocation2 + $0x8] sm:$0xff]  ;;  %v358_v13 = vld [vmem:[#allocation2] sm:$0xff]  ;;  %vm248_vm1 = vcmp.eq.s32.totalorder %v247_v39, %v236_v34 }
  0x12   :  { %129 = vmatpush.bf16.msra.mxu0 %v364_v1  ;;  %v59_v14 = vld [vmem:[%s563_s0] sm:$0xf]  ;;  %v367_v15 = vld [vmem:[#allocation5 + $0x8] sm:$0xff] }
  0x13   :  { %212 = vmatpush.bf16.msra.mxu1 %v372_v3  ;;  %v366_v16 = vld [vmem:[#allocation5] sm:$0xff] }
  0x14   :  { %v382_v17 = vld [vmem:[%s566_s3] ss:$0 sm:$0xff] }
  0x15   :  { %v383_v24 = vld [vmem:[%s568_s5] ss:$0 sm:$0xff] }
  0x16   :  { %130 = vmatpush.bf16.msra.mxu0 %v363_v4  ;;  %v237_v28 = vld [vmem:[%s564_s1] sm:$0xff]  ;;  %s498_s1 = smov [#allocation8]  }
  0x17   :  { %213 = vmatpush.bf16.msra.mxu1 %v371_v5  ;;  %s276_s6 = sshll.u32 %s498_s1, 4  ;;  %s277_s6 = int_to_ptr.vmem [resolvable:$true] %s276_s6 }
  0x1a   :  { %131 = vmatpush.bf16.msra.mxu0 %v362_v6 }
  0x1b   :  { %214 = vmatpush.bf16.msra.mxu1 %v370_v7 }
  0x1e   :  { %132 = vmatpush.bf16.msra.mxu0 %v361_v8 }
  0x1f   :  { %215 = vmatpush.bf16.msra.mxu1 %v369_v9 }
  0x22   :  { %133 = vmatpush.bf16.msra.mxu0 %v360_v10 }
  0x23   :  { %216 = vmatpush.bf16.msra.mxu1 %v368_v11 }
  0x26   :  { %134 = vmatpush.bf16.msra.mxu0 %v359_v12 }
  0x27   :  { %217 = vmatpush.bf16.msra.mxu1 %v367_v15 }
  0x2a   :  { %135 = vmatpush.bf16.msra.mxu0 %v358_v13 }
  0x2b   :  { %218 = vmatpush.bf16.msra.mxu1 %v366_v16 }
  0x2d   :  { %136 = vmatmul.bf16.vlgmr.msra.gmra.mxu0 %v59_v14 }
  0xaa   :  { %v137_v18 = vpop.f32.mrf.mxu0 }
  0xab   :  { %v138_v19 = vadd.f32 %v382_v17, %v137_v18 }
  0xad   :  { %v141_v20 = vmax.f32 %v138_v19, 0.0 }
  0xaf   :  { %v142_v21 = vpack.c.bf16 %v141_v20, %v141_v20 }
  0xb1   :  { %219 = vmatmul.bf16.vlgmr.msra.gmra.mxu1 %v142_v21 }
  0xb2   :  { %v139_v22 = vpop.f32.mrf.mxu0 }
 0x12e   :  { %v220_v25 = vpop.f32.mrf.mxu1 }
 0x12f   :  { %v221_v26 = vadd.f32 %v383_v24, %v220_v25 }
 0x131   :  { %224 = vst [vmem:[#allocation7] sm:$0xff] %v221_v26  ;;  %225 = vmax.xlane.f32.xlu0 %v221_v26 }
 0x132   :  { %270 = dma.vmem_to_hbm [thread:$0]  %s266_s20, 128, %s268_s18, [#allocation4]  }
 0x136   :  { %v222_v27 = vpop.f32.mrf.mxu1 }
 0x145   :  { %239 = vperm.xlu0 %381, %v237_v28  }
 0x1a4   :  { %v226_v29 = vpop.xlane.xlu0 %225 }
 0x1a5   :  { %v227_v30 = vsub.f32 %v221_v26, %v226_v29 }
 0x1a7   :  { %v228_v31 = vmul.f32 1.442695, %v227_v30 }
 0x1a9   :  { %384 = vpow2.f32 %v228_v31 }
 0x1af   :  { %v385_v32 = vpop.eup %384 }
 0x1b0   :  { %230 = vadd.xlane.f32.xlu1 %v385_v32 }
 0x1b7   :  { %v240_v35 = vpop.permute.xlu0 %239 }
 0x1b8   :  { %vm241_vm0 = vcmp.eq.s32.totalorder %v236_v34, %v240_v35 }
 0x1b9   :  { %v242_v36 = vsel %vm241_vm0, %v221_v26, 0.0 }
 0x1ba   :  { %243 = vadd.xlane.f32.xlu1 %v242_v36 }
 0x223   :  { %v231_v37 = vpop.xlane.xlu1 %230 }
 0x224   :  { %386 = vlog2.f32 %v231_v37 }
 0x22a   :  { %v387_v38 = vpop.eup %386 }
 0x22b   :  { %v233_v40 = vmul.f32 0.6931472, %v387_v38 }
 0x22d   :  { %v234_v41 = vadd.f32 %v233_v40, %v226_v29  ;;  %v244_v42 = vpop.xlane.xlu1 %243 }
 0x22f   :  { %v245_v43 = vsub.f32 %v234_v41, %v244_v42 }
 0x231   :  { %v249_v44 = vsel %vm248_vm1, %v245_v43, 0.0 }
 0x232   :  { %v251_v45 = vsel %vm250_vm2, %v249_v44, 0.0 }
 0x233   :  { %v252_v46 = vrot.slane %v251_v45, 4 }
 0x235   :  { %v253_v47 = vadd.f32 %v252_v46, %v251_v45 }
 0x237   :  { %v254_v48 = vrot.slane %v253_v47, 2 }
 0x239   :  { %v255_v49 = vadd.f32 %v254_v48, %v253_v47 }
 0x23b   :  { %v256_v50 = vrot.slane %v255_v49, 1 }
 0x23d   :  { %v257_v51 = vadd.f32 %v256_v50, %v255_v49 }
 0x23f   :  { %259 = vst.msk [vmem:[#allocation8] sm:$0x1] %vm258_vm3, %v257_v51 }
 0x240   :  { %281 = dma.vmem_to_hbm [thread:$0]  %s277_s6, 16, %s279_s23, [#allocation9]  }
 0x241   :  { %488 = dma.done.wait [#allocation4], 128  }
 0x242   :  { %489 = vsyncadd [#allocation4], 4294967168 }
 0x243   :  { %490 = dma.done.wait [#allocation9], 16  }
 0x244   :  { %491 = vsyncadd [#allocation9], 4294967280 }
 0x245   :  { %290 = vsyncpa [#allocation3], 1 }
 0x246   :  { %291 = vsyncpa [#allocation6], 1 }
 0x247   :  { %292 = vsyncpa [#allocation4], 1 }
 0x248   :  { %293 = vsyncpa [#allocation9], 1 }

// kernel: tpu_custom_call.1
= control target key start
LH: loop header
LB: loop body
LE: loop exit
PB: predicated region body
PF: predicated region fallthrough
CT: control target
= control target key end

     0   :  { %13 = vsyncpa [#allocation3], 0  ;;  %s563_s0 = inlined_call_operand.vmem [shape: bf16[8,128], index: 0, kind: input, shape index: {}]   ;;  %s564_s1 = inlined_call_operand.vmem [shape: s32[8,1], index: 1, kind: input, shape index: {}]   ;;  %s565_s2 = inlined_call_operand.hbm [shape: bf16[128,128], index: 2, kind: input, shape index: {}]   ;;  %s566_s3 = inlined_call_operand.vmem [shape: f32[1,128], index: 3, kind: input, shape index: {}]   ;;  %s567_s4 = inlined_call_operand.hbm [shape: bf16[128,128], index: 4, kind: input, shape index: {}]   ;;  %s568_s5 = inlined_call_operand.vmem [shape: f32[1,128], index: 5, kind: input, shape index: {}]   ;;  %s569_s6 = inlined_call_operand.hbm [shape: f32[8,128], index: 6, kind: output, shape index: {0}]   ;;  %s570_s7 = inlined_call_operand.hbm [shape: f32[1,8], index: 7, kind: output, shape index: {1}]  }
   0x1   :  { %14 = vsyncpa [#allocation6], 0 }
   0x2   :  { %15 = vsyncpa [#allocation4], 0 }
   0x3   :  { %16 = vsyncpa [#allocation9], 0  ;;  %s25_s26 = sshll.u32 %s565_s2, 4  ;;  %s492_s27 = smov [#allocation2]   ;;  %s26_s26 = int_to_ptr.hbm [resolvable:$true] %s25_s26 }
   0x4   :  { %s27_s28 = sshll.u32 %s492_s27, 4  ;;  %s40_s8 = sshll.u32 %s567_s4, 4  ;;  %s28_s28 = int_to_ptr.vmem [resolvable:$true] %s27_s28  ;;  %s41_s8 = int_to_ptr.hbm [resolvable:$true] %s40_s8 }
   0x5   :  { %s493_s9 = smov 64   ;;  %s494_s10 = smov 4  }
   0x6   :  { %33 = dma.hbm_to_vmem [thread:$0]  %s26_s26, 1024, %s28_s28, [#allocation3], %s493_s9, %s493_s9, %s494_s10  }
   0x7   :  { %s495_s11 = smov [#allocation5]  }
   0x8   :  { %s42_s12 = sshll.u32 %s495_s11, 4  ;;  %s43_s12 = int_to_ptr.vmem [resolvable:$true] %s42_s12 }
   0x9   :  { %48 = dma.hbm_to_vmem [thread:$0]  %s41_s8, 1024, %s43_s12, [#allocation6], %s493_s9, %s493_s9, %s494_s10  }
   0xa   :  { %484 = dma.done.wait [#allocation3], 1024  }
   0xb   :  { %485 = vsyncadd [#allocation3], 4294966272 }
   0xc   :  { %486 = dma.done.wait [#allocation6], 1024  }
   0xd   :  { %487 = vsyncadd [#allocation6], 4294966272  ;;  %v365_v0 = vld [vmem:[#allocation2 + $0x38] sm:$0xff]  ;;  %v364_v1 = vld [vmem:[#allocation2 + $0x30] sm:$0xff]  ;;  %v496_v23 = vmov 0   ;;  %v235_v33 = vlaneseq  ;;  %s267_s18 = sshll.u32 %s569_s6, 4  ;;  %s268_s18 = int_to_ptr.hbm [resolvable:$true] %s267_s18 }
   0xe   :  { %128 = vmatpush.bf16.msra.mxu0 %v365_v0  ;;  %v373_v2 = vld [vmem:[#allocation5 + $0x38] sm:$0xff]  ;;  %v372_v3 = vld [vmem:[#allocation5 + $0x30] sm:$0xff]  ;;  %v363_v4 = vld [vmem:[#allocation2 + $0x28] sm:$0xff]  ;;  %381 = vset.pattern.permute.xlu0 %v496_v23  ;;  %s497_s19 = smov [#allocation7]   ;;  %vm250_vm2 = vcmask 64512   ;;  %s278_s23 = sshll.u32 %s570_s7, 4  ;;  %s279_s23 = int_to_ptr.hbm [resolvable:$true] %s278_s23 }
   0xf   :  { %211 = vmatpush.bf16.msra.mxu1 %v373_v2  ;;  %v371_v5 = vld [vmem:[#allocation5 + $0x28] sm:$0xff]  ;;  %v362_v6 = vld [vmem:[#allocation2 + $0x20] sm:$0xff]  ;;  %v361_v8 = vld [vmem:[#allocation2 + $0x18] sm:$0xff]  ;;  %v236_v34 = vand.u32 127, %v235_v33  ;;  %s265_s20 = sshll.u32 %s497_s19, 4  ;;  %v247_v39 = vshrl.u32 %v235_v33, 7  ;;  %s266_s20 = int_to_ptr.vmem [resolvable:$true] %s265_s20 }
  0x10   :  { %v370_v7 = vld [vmem:[#allocation5 + $0x20] sm:$0xff]  ;;  %v369_v9 = vld [vmem:[#allocation5 + $0x18] sm:$0xff]  ;;  %v360_v10 = vld [vmem:[#allocation2 + $0x10] sm:$0xff]  ;;  %vm258_vm3 = vcmask 57344  }
  0x11   :  { %v368_v11 = vld [vmem:[#allocation5 + $0x10] sm:$0xff]  ;;  %v359_v12 = vld [vmem:[#allocation2 + $0x8] sm:$0xff]  ;;  %v358_v13 = vld [vmem:[#allocation2] sm:$0xff]  ;;  %vm248_vm1 = vcmp.eq.s32.totalorder %v247_v39, %v236_v34 }
  0x12   :  { %129 = vmatpush.bf16.msra.mxu0 %v364_v1  ;;  %v59_v14 = vld [vmem:[%s563_s0] sm:$0xf]  ;;  %v367_v15 = vld [vmem:[#allocation5 + $0x8] sm:$0xff] }
  0x13   :  { %212 = vmatpush.bf16.msra.mxu1 %v372_v3  ;;  %v366_v16 = vld [vmem:[#allocation5] sm:$0xff] }
  0x14   :  { %v382_v17 = vld [vmem:[%s566_s3] ss:$0 sm:$0xff] }
  0x15   :  { %v383_v24 = vld [vmem:[%s568_s5] ss:$0 sm:$0xff] }
  0x16   :  { %130 = vmatpush.bf16.msra.mxu0 %v363_v4  ;;  %v237_v28 = vld [vmem:[%s564_s1] sm:$0xff]  ;;  %s498_s1 = smov [#allocation8]  }
  0x17   :  { %213 = vmatpush.bf16.msra.mxu1 %v371_v5  ;;  %s276_s6 = sshll.u32 %s498_s1, 4  ;;  %s277_s6 = int_to_ptr.vmem [resolvable:$true] %s276_s6 }
  0x1a   :  { %131 = vmatpush.bf16.msra.mxu0 %v362_v6 }
  0x1b   :  { %214 = vmatpush.bf16.msra.mxu1 %v370_v7 }
  0x1e   :  { %132 = vmatpush.bf16.msra.mxu0 %v361_v8 }
  0x1f   :  { %215 = vmatpush.bf16.msra.mxu1 %v369_v9 }
  0x22   :  { %133 = vmatpush.bf16.msra.mxu0 %v360_v10 }
  0x23   :  { %216 = vmatpush.bf16.msra.mxu1 %v368_v11 }
  0x26   :  { %134 = vmatpush.bf16.msra.mxu0 %v359_v12 }
  0x27   :  { %217 = vmatpush.bf16.msra.mxu1 %v367_v15 }
  0x2a   :  { %135 = vmatpush.bf16.msra.mxu0 %v358_v13 }
  0x2b   :  { %218 = vmatpush.bf16.msra.mxu1 %v366_v16 }
  0x2d   :  { %136 = vmatmul.bf16.vlgmr.msra.gmra.mxu0 %v59_v14 }
  0xaa   :  { %v137_v18 = vpop.f32.mrf.mxu0 }
  0xab   :  { %v138_v19 = vadd.f32 %v382_v17, %v137_v18 }
  0xad   :  { %v141_v20 = vmax.f32 %v138_v19, 0.0 }
  0xaf   :  { %v142_v21 = vpack.c.bf16 %v141_v20, %v141_v20 }
  0xb1   :  { %219 = vmatmul.bf16.vlgmr.msra.gmra.mxu1 %v142_v21 }
  0xb2   :  { %v139_v22 = vpop.f32.mrf.mxu0 }
 0x12e   :  { %v220_v25 = vpop.f32.mrf.mxu1 }
 0x12f   :  { %v221_v26 = vadd.f32 %v383_v24, %v220_v25 }
 0x131   :  { %224 = vst [vmem:[#allocation7] sm:$0xff] %v221_v26  ;;  %225 = vmax.xlane.f32.xlu0 %v221_v26 }
 0x132   :  { %270 = dma.vmem_to_hbm [thread:$0]  %s266_s20, 128, %s268_s18, [#allocation4]  }
 0x136   :  { %v222_v27 = vpop.f32.mrf.mxu1 }
 0x145   :  { %239 = vperm.xlu0 %381, %v237_v28  }
 0x1a4   :  { %v226_v29 = vpop.xlane.xlu0 %225 }
 0x1a5   :  { %v227_v30 = vsub.f32 %v221_v26, %v226_v29 }
 0x1a7   :  { %v228_v31 = vmul.f32 1.442695, %v227_v30 }
 0x1a9   :  { %384 = vpow2.f32 %v228_v31 }
 0x1af   :  { %v385_v32 = vpop.eup %384 }
 0x1b0   :  { %230 = vadd.xlane.f32.xlu1 %v385_v32 }
 0x1b7   :  { %v240_v35 = vpop.permute.xlu0 %239 }
 0x1b8   :  { %vm241_vm0 = vcmp.eq.s32.totalorder %v236_v34, %v240_v35 }
 0x1b9   :  { %v242_v36 = vsel %vm241_vm0, %v221_v26, 0.0 }
 0x1ba   :  { %243 = vadd.xlane.f32.xlu1 %v242_v36 }
 0x223   :  { %v231_v37 = vpop.xlane.xlu1 %230 }
 0x224   :  { %386 = vlog2.f32 %v231_v37 }
 0x22a   :  { %v387_v38 = vpop.eup %386 }
 0x22b   :  { %v233_v40 = vmul.f32 0.6931472, %v387_v38 }
 0x22d   :  { %v234_v41 = vadd.f32 %v233_v40, %v226_v29  ;;  %v244_v42 = vpop.xlane.xlu1 %243 }
 0x22f   :  { %v245_v43 = vsub.f32 %v234_v41, %v244_v42 }
 0x231   :  { %v249_v44 = vsel %vm248_vm1, %v245_v43, 0.0 }
 0x232   :  { %v251_v45 = vsel %vm250_vm2, %v249_v44, 0.0 }
 0x233   :  { %v252_v46 = vrot.slane %v251_v45, 4 }
 0x235   :  { %v253_v47 = vadd.f32 %v252_v46, %v251_v45 }
 0x237   :  { %v254_v48 = vrot.slane %v253_v47, 2 }
 0x239   :  { %v255_v49 = vadd.f32 %v254_v48, %v253_v47 }
 0x23b   :  { %v256_v50 = vrot.slane %v255_v49, 1 }
 0x23d   :  { %v257_v51 = vadd.f32 %v256_v50, %v255_v49 }
 0x23f   :  { %259 = vst.msk [vmem:[#allocation8] sm:$0x1] %vm258_vm3, %v257_v51 }
 0x240   :  { %281 = dma.vmem_to_hbm [thread:$0]  %s277_s6, 16, %s279_s23, [#allocation9]  }
 0x241   :  { %488 = dma.done.wait [#allocation4], 128  }
 0x242   :  { %489 = vsyncadd [#allocation4], 4294967168 }
 0x243   :  { %490 = dma.done.wait [#allocation9], 16  }
 0x244   :  { %491 = vsyncadd [#allocation9], 4294967280 }
 0x245   :  { %290 = vsyncpa [#allocation3], 1 }
 0x246   :  { %291 = vsyncpa [#allocation6], 1 }
 0x247   :  { %292 = vsyncpa [#allocation4], 1 }
 0x248   :  { %293 = vsyncpa [#allocation9], 1 }

</bundles_post_ra>
